<compile_context>
chip_gen: v7x
topology: tpu7x:2x2x1
jax: 0.10.0
libtpu: 0.0.40
codegen_flags: <defaults>
</compile_context>

<pallas_src>
import math

import jax
import jax.numpy as jnp
from jax.experimental import pallas as pl
from jax.experimental.pallas import tpu as pltpu


LANE = 128
COLS = 8 * LANE                # lane-dense slab width: 1024
MAX_TILE_ROWS_TT = 1024        # 2 streamed f32 tensors: ~20 MiB double-buffered
MAX_TILE_ROWS_SCALAR = 2048    # 1 streamed tensor:      ~22 MiB double-buffered


# ----------------------------------------------------------------------------
# Kernels
# ----------------------------------------------------------------------------
def _ge_tt_kernel(x_ref, y_ref, o_ref):
    # tensor >= tensor, elementwise on the VPU.
    o_ref[...] = (x_ref[...] >= y_ref[...]).astype(o_ref.dtype)


def _ge_ts_kernel(x_ref, s_ref, o_ref):
    # tensor >= scalar; scalar lives in SMEM as a 32-bit value, compare is
    # done in that 32-bit type (exact superset of bf16/f16/int8/16/uint8/16).
    s = s_ref[0]
    o_ref[...] = (x_ref[...].astype(s.dtype) >= s).astype(o_ref.dtype)


def _ge_st_kernel(s_ref, x_ref, o_ref):
    # scalar >= tensor.
    s = s_ref[0]
    o_ref[...] = (s >= x_ref[...].astype(s.dtype)).astype(o_ref.dtype)


# ----------------------------------------------------------------------------
# Bool-I/O capability probe (one tiny call, cached)
# ----------------------------------------------------------------------------
_BOOL_IO_OK = None


def _bool_kernel_io_ok():
    global _BOOL_IO_OK
    if _BOOL_IO_OK is None:
        def probe_kernel(x_ref, o_ref):
            o_ref[...] = x_ref[...] >= jnp.float32(0.0)

        try:
            res = pl.pallas_call(
                probe_kernel,
                out_shape=jax.ShapeDtypeStruct((8, LANE), jnp.bool_),
            )(jnp.zeros((8, LANE), jnp.float32))
            jax.block_until_ready(res)
            _BOOL_IO_OK = True
        except Exception:
            _BOOL_IO_OK = False
    return _BOOL_IO_OK


# ----------------------------------------------------------------------------
# Geometry / dtype helpers
# ----------------------------------------------------------------------------
def _smem_scalar_dtype(dt):
    """32-bit SMEM transport dtype for a scalar operand, or None if unsupported."""
    dt = jnp.dtype(dt)
    if dt in (jnp.dtype(jnp.float32), jnp.dtype(jnp.bfloat16), jnp.dtype(jnp.float16)):
        return jnp.float32
    if dt in (jnp.dtype(jnp.int32), jnp.dtype(jnp.int16), jnp.dtype(jnp.int8),
              jnp.dtype(jnp.uint16), jnp.dtype(jnp.uint8)):
        return jnp.int32
    return None


def _choose_tile_rows(rows, n_streamed):
    """Row-tile size for a (rows, COLS) slab with `n_streamed` streamed tensors."""
    max_tile = MAX_TILE_ROWS_TT if n_streamed == 2 else MAX_TILE_ROWS_SCALAR
    if rows <= 64:
        return rows                      # single full-extent block
    steps = max(2, -(-rows // max_tile))  # cdiv, at least 2 steps
    if steps % 2:
        steps += 1                        # even step count balances v7x megacore
    tile = -(-rows // steps)              # cdiv
    tile = -(-tile // 32) * 32            # multiple of 32 for packed bool output
    return tile


# ----------------------------------------------------------------------------
# pallas_call wrapper
# ----------------------------------------------------------------------------
def _run_ge(tensor2d, other, mode, out_dtype):
    rows, _ = tensor2d.shape
    n_streamed = 2 if mode == "tt" else 1
    tile_rows = _choose_tile_rows(rows, n_streamed)
    grid = (pl.cdiv(rows, tile_rows),)

    tspec = pl.BlockSpec((tile_rows, COLS), lambda i: (i, 0))
    ospec = pl.BlockSpec((tile_rows, COLS), lambda i: (i, 0))
    sspec = pl.BlockSpec(memory_space=pltpu.MemorySpace.SMEM)

    if mode == "tt":
        kernel, in_specs, args = _ge_tt_kernel, [tspec, tspec], (tensor2d, other)
    elif mode == "ts":
        kernel, in_specs, args = _ge_ts_kernel, [tspec, sspec], (tensor2d, other)
    else:  # "st"
        kernel, in_specs, args = _ge_st_kernel, [sspec, tspec], (other, tensor2d)

    # Explicit VMEM budget: double-buffered streamed inputs + output, plus
    # margin.  Keeps the 1024/2048-row tiles compiling on v5e's 16 MiB default
    # scoped limit and documents the footprint for v7x's 64 MiB physical VMEM.
    in_bytes = n_streamed * tensor2d.dtype.itemsize
    out_bytes = jnp.dtype(out_dtype).itemsize
    tile_bytes = tile_rows * COLS * (in_bytes + out_bytes)
    vmem_limit = max(int(2 * tile_bytes + (4 << 20)), 16 << 20)

    return pl.pallas_call(
        kernel,
        out_shape=jax.ShapeDtypeStruct((rows, COLS), out_dtype),
        grid=grid,
        in_specs=in_specs,
        out_specs=ospec,
        compiler_params=pltpu.CompilerParams(
            dimension_semantics=("parallel",),
            vmem_limit_bytes=vmem_limit,
        ),
    )(*args)


# ----------------------------------------------------------------------------
# Public entry point (matches `input_ >= other_` with broadcasting)
# ----------------------------------------------------------------------------
def greater_equal(input_, other_):
    """Elementwise `input_ >= other_` with broadcasting; returns jnp.bool_."""
    x = jnp.asarray(input_)
    y = jnp.asarray(other_)
    out_shape = jnp.broadcast_shapes(x.shape, y.shape)
    n = math.prod(out_shape)
    if n == 0:
        return jnp.zeros(out_shape, dtype=jnp.bool_)

    dt = jnp.result_type(x, y)
    if x.dtype != dt:
        x = x.astype(dt)
    if y.dtype != dt:
        y = y.astype(dt)

    # Mode selection: scalar operands ride through SMEM (no HBM broadcast).
    smem_dt = _smem_scalar_dtype(dt)
    scalar = None
    other_full = None
    if smem_dt is not None and y.size == 1 and x.size == n:
        mode, tensor = "ts", x
        scalar = y.reshape(-1).astype(smem_dt)
    elif smem_dt is not None and x.size == 1 and y.size == n:
        mode, tensor = "st", y
        scalar = x.reshape(-1).astype(smem_dt)
    else:
        mode = "tt"
        # TODO(synk): stream row/column-vector broadcasts via an index_map that
        # repeats the small operand instead of materializing broadcast_to.
        tensor = x if x.shape == out_shape else jnp.broadcast_to(x, out_shape)
        other_full = y if y.shape == out_shape else jnp.broadcast_to(y, out_shape)

    out_dtype = jnp.bool_ if _bool_kernel_io_ok() else jnp.uint8

    t_flat = tensor.reshape(-1)
    o_flat = other_full.reshape(-1) if mode == "tt" else None

    rem = n % COLS
    nbulk = n - rem

    bulk_flat = None
    if nbulk:
        rows = nbulk // COLS
        if rem:
            t2d = t_flat[:nbulk].reshape(rows, COLS)
            o2d = o_flat[:nbulk].reshape(rows, COLS) if mode == "tt" else scalar
        else:
            # Aligned fast path: reshape only, no pad / slice.
            t2d = t_flat.reshape(rows, COLS)
            o2d = o_flat.reshape(rows, COLS) if mode == "tt" else scalar
        out2d = _run_ge(t2d, o2d, mode, out_dtype)
        bulk_flat = out2d.reshape(-1)
        if out_dtype is not jnp.bool_:
            bulk_flat = bulk_flat.astype(jnp.bool_)   # uint8 fallback only

    if rem:
        # <1024-element tail: one tiny jnp op instead of padding the whole array.
        t_tail = t_flat[nbulk:]
        if mode == "tt":
            tail = t_tail >= o_flat[nbulk:]
        elif mode == "ts":
            tail = t_tail.astype(scalar.dtype) >= scalar[0]
        else:  # "st"
            tail = scalar[0] >= t_tail.astype(scalar.dtype)
        tail = tail.astype(jnp.bool_)
        flat = tail if bulk_flat is None else jnp.concatenate([bulk_flat, tail])
    else:
        flat = bulk_flat

    return flat.reshape(out_shape)


# ----------------------------------------------------------------------------
# Self-test
# ----------------------------------------------------------------------------
if __name__ == "__main__":
    key = jax.random.PRNGKey(0)
    k1, k2, k3 = jax.random.split(key, 3)

    # Small NCHW operand pair matching the module's forward (aligned fast path).
    shape = (2, 4, 16, 16)
    input_ = jax.random.normal(k1, shape, dtype=jnp.float32)
    other_ = jax.random.normal(k2, shape, dtype=jnp.float32)

    out = greater_equal(input_, other_)
    jax.block_until_ready(out)
    ref = input_ >= other_
    assert out.dtype == jnp.bool_
    assert out.shape == ref.shape
    assert bool(jnp.all(out == ref))

    # tensor >= scalar: exercises the SMEM scalar path (no materialized broadcast).
    scalar = jnp.float32(0.25)
    out_s = greater_equal(input_, scalar)
    jax.block_until_ready(out_s)
    assert bool(jnp.all(out_s == (input_ >= scalar)))

    # scalar >= tensor: reversed operand order through the SMEM path.
    out_r = greater_equal(scalar, input_)
    jax.block_until_ready(out_r)
    assert bool(jnp.all(out_r == (scalar >= input_)))

    # Non-1024-multiple size: exercises the bulk-kernel + jnp-tail path.
    odd = jax.random.normal(k3, (3, 5, 7, 11), dtype=jnp.float32)
    out_o = greater_equal(odd, odd * 0.5)
    jax.block_until_ready(out_o)
    assert bool(jnp.all(out_o == (odd >= odd * 0.5)))

    print("KERNEL_OK")
</pallas_src>

<mosaic_0001>
module attributes {stable_mosaic.version = 11 : i64} {
  func.func @probe_kernel(%arg0: memref<8x128xf32, #tpu.memory_space<vmem>>, %arg1: memref<8x128xi32, #tpu.memory_space<vmem>>) attributes {dimension_semantics = [], scalar_prefetch = 0 : i64, scratch_operands = 0 : i64, tpu.core_type = #tpu.core_type<tc>} {
    %c0 = arith.constant 0 : index
    %c0_0 = arith.constant 0 : index
    %0 = vector.load %arg0[%c0, %c0_0] : memref<8x128xf32, #tpu.memory_space<vmem>>, vector<8x128xf32>
    %cst = arith.constant 0.000000e+00 : f32
    %1 = vector.broadcast %cst : f32 to vector<8x128xf32>
    %2 = arith.cmpf oge, %0, %1 : vector<8x128xf32>
    %c0_1 = arith.constant 0 : index
    %c0_2 = arith.constant 0 : index
    %3 = vector.load %arg1[%c0_1, %c0_2] : memref<8x128xi32, #tpu.memory_space<vmem>>, vector<8x128xi32>
    %4 = arith.extui %2 : vector<8x128xi1> to vector<8x128xi32>
    %cst_3 = arith.constant dense<0> : vector<8x128xi32>
    %5 = arith.cmpi ne, %3, %cst_3 : vector<8x128xi32>
    tpu.vector_store %arg1[%c0_1, %c0_2], %4 {strides = array<i32>} : memref<8x128xi32, #tpu.memory_space<vmem>>, vector<8x128xi32>,
    return
  }
}

module attributes {stable_mosaic.version = 11 : i64} {
  func.func @_ge_tt_kernel(%arg0: i32, %arg1: memref<2x1024xf32, #tpu.memory_space<vmem>>, %arg2: memref<2x1024xf32, #tpu.memory_space<vmem>>, %arg3: memref<2x1024xi8, #tpu.memory_space<vmem>>) attributes {dimension_semantics = [#tpu.dimension_semantics<parallel>], iteration_bounds = array<i64: 1>, scalar_prefetch = 0 : i64, scratch_operands = 0 : i64, tpu.core_type = #tpu.core_type<tc>, window_params = [{transform_indices = @transform_0, window_bounds = array<i64: 2, 1024>}, {transform_indices = @transform_1, window_bounds = array<i64: 2, 1024>}, {transform_indices = @transform_2, window_bounds = array<i64: 2, 1024>}]} {
    %c0 = arith.constant 0 : index
    %c0_0 = arith.constant 0 : index
    %0 = vector.load %arg1[%c0, %c0_0] : memref<2x1024xf32, #tpu.memory_space<vmem>>, vector<2x1024xf32>
    %c0_1 = arith.constant 0 : index
    %c0_2 = arith.constant 0 : index
    %1 = vector.load %arg2[%c0_1, %c0_2] : memref<2x1024xf32, #tpu.memory_space<vmem>>, vector<2x1024xf32>
    %2 = arith.cmpf oge, %0, %1 : vector<2x1024xf32>
    %3 = arith.extui %2 : vector<2x1024xi1> to vector<2x1024xi8>
    %c0_3 = arith.constant 0 : index
    %c0_4 = arith.constant 0 : index
    %4 = vector.load %arg3[%c0_3, %c0_4] : memref<2x1024xi8, #tpu.memory_space<vmem>>, vector<2x1024xi8>
    tpu.vector_store %arg3[%c0_3, %c0_4], %3 {strides = array<i32>} : memref<2x1024xi8, #tpu.memory_space<vmem>>, vector<2x1024xi8>,
    return
  }
  func.func @transform_0(%arg0: i32) -> (i32, i32) {
    %c0_i32 = arith.constant 0 : i32
    %c0_i32_0 = arith.constant 0 : i32
    return %arg0, %c0_i32 : i32, i32
  }
  func.func @transform_1(%arg0: i32) -> (i32, i32) {
    %c0_i32 = arith.constant 0 : i32
    %c0_i32_0 = arith.constant 0 : i32
    return %arg0, %c0_i32 : i32, i32
  }
  func.func @transform_2(%arg0: i32) -> (i32, i32) {
    %c0_i32 = arith.constant 0 : i32
    %c0_i32_0 = arith.constant 0 : i32
    return %arg0, %c0_i32 : i32, i32
  }
}

</mosaic_0001>

<bundles_post_ra>
// kernel: tpu_custom_call.1
= control target key start
LH: loop header
LB: loop body
LE: loop exit
PB: predicated region body
PF: predicated region fallthrough
CT: control target
= control target key end

     0   :  { %6 = vsyncpa [#allocation3], 0  ;;  %s55_s6 = smov [#allocation2]   ;;  %s82_s0 = inlined_call_operand.hbm [shape: f32[8,128], index: 0, kind: input, shape index: {}]   ;;  %s83_s1 = inlined_call_operand.vmem [shape: s32[8,128], index: 1, kind: output, shape index: {}]  }
   0x1   :  { %s13_s7 = sshll.u32 %s55_s6, 4  ;;  %s31_s10 = scalar_lea.hbm %s82_s0, 128  ;;  %s14_s7 = int_to_ptr.vmem [resolvable:$true] %s13_s7 }
   0x2   :  { %p32_p0 = scmp.ne.s32.totalorder %s82_s0, %s31_s10  ;;  %p35_p1 = scmp.lt.u32.totalorder %s31_s10, %s82_s0 }
   0x4   :  { %p37_p2 = pnand %p35_p1, %p32_p0 }
   0x6   :  { %40 = shalt.err (!%p37_p2)
}
   0x7   :  { %s41_s15 = scalar_lea.vmem %s14_s7, 128  ;;  %p46_p4 = scmp.lt.s32.totalorder %s14_s7, %s14_s7 }
   0x8   :  { %p42_p3 = scmp.ne.s32.totalorder %s14_s7, %s41_s15  ;;  %p47_p5 = scmp.lt.s32.totalorder %s41_s15, %s41_s15 }
   0xa   :  { %p48_p6 = por %p47_p5, %p46_p4 }
   0xc   :  { %p49_p7 = pnand %p48_p6, %p42_p3 }
   0xe   :  { %52 = shalt.err (!%p49_p7)
}
   0xf   :  { %16 = dma.hbm_to_vmem [thread:$0]  %s82_s0, 128, %s14_s7, [#allocation3]  }
  0x10   :  { %53 = dma.done.wait [#allocation3], 128  }
  0x11   :  { %54 = vsyncadd [#allocation3], 4294967168  ;;  %v20_v0 = vld [vmem:[#allocation2] sm:$0xff]  ;;  %v56_v1 = vmov 0  }
  0x12   :  { %vm21_vm0 = vcmp.ge.f32.partialorder %v20_v0, 0.0 }
  0x13   :  { %v22_v2 = vsel %vm21_vm0, 1, %v56_v1 }
  0x14   :  { %23 = vst [vmem:[%s83_s1] sm:$0xff] %v22_v2 }
  0x15   :  { %28 = vsyncpa [#allocation3], 1 }

// kernel: tpu_custom_call.1
= control target key start
LH: loop header
LB: loop body
LE: loop exit
PB: predicated region body
PF: predicated region fallthrough
CT: control target
= control target key end

     0   :  { %7 = vsyncpa [#allocation3], 0  ;;  %s463_s0 = inlined_call_operand.hbm [shape: f32[2,1024], index: 0, kind: input, shape index: {}]   ;;  %s464_s1 = inlined_call_operand.hbm [shape: f32[2,1024], index: 1, kind: input, shape index: {}]   ;;  %s465_s2 = inlined_call_operand.hbm [shape: u8[2,1024], index: 2, kind: output, shape index: {}]  }
   0x1   :  { %8 = vsyncpa [#allocation6], 0 }
   0x2   :  { %9 = vsyncpa [#allocation4], 0  ;;  %s331_s9 = smov [#allocation2]   ;;  %s332_s11 = smov [#allocation5]  }
   0x3   :  { %s16_s10 = sshll.u32 %s331_s9, 4  ;;  %s26_s12 = sshll.u32 %s332_s11, 4  ;;  %s17_s10 = int_to_ptr.vmem [resolvable:$true] %s16_s10  ;;  %s27_s12 = int_to_ptr.vmem [resolvable:$true] %s26_s12 }
   0x4   :  { %s259_s15 = scalar_lea.hbm %s463_s0, 256 }
   0x5   :  { %p260_p0 = scmp.ne.s32.totalorder %s463_s0, %s259_s15  ;;  %p263_p1 = scmp.lt.u32.totalorder %s259_s15, %s463_s0 }
   0x7   :  { %p265_p2 = pnand %p263_p1, %p260_p0 }
   0x9   :  { %268 = shalt.err (!%p265_p2)
}
   0xa   :  { %s269_s20 = scalar_lea.vmem %s17_s10, 256  ;;  %p274_p4 = scmp.lt.s32.totalorder %s17_s10, %s17_s10 }
   0xb   :  { %p270_p3 = scmp.ne.s32.totalorder %s17_s10, %s269_s20  ;;  %p275_p5 = scmp.lt.s32.totalorder %s269_s20, %s269_s20 }
   0xd   :  { %p276_p6 = por %p275_p5, %p274_p4 }
   0xf   :  { %p277_p7 = pnand %p276_p6, %p270_p3 }
  0x11   :  { %280 = shalt.err (!%p277_p7)
}
  0x12   :  { %19 = dma.hbm_to_vmem [thread:$0]  %s463_s0, 256, %s17_s10, [#allocation3]  }
  0x13   :  { %s281_s25 = scalar_lea.hbm %s464_s1, 256 }
  0x14   :  { %p282_p8 = scmp.ne.s32.totalorder %s464_s1, %s281_s25  ;;  %p285_p9 = scmp.lt.u32.totalorder %s281_s25, %s464_s1 }
  0x16   :  { %p287_p10 = pnand %p285_p9, %p282_p8 }
  0x18   :  { %290 = shalt.err (!%p287_p10)
}
  0x19   :  { %s291_s30 = scalar_lea.vmem %s27_s12, 256  ;;  %p296_p12 = scmp.lt.s32.totalorder %s27_s12, %s27_s12 }
  0x1a   :  { %p292_p11 = scmp.ne.s32.totalorder %s27_s12, %s291_s30  ;;  %p297_p13 = scmp.lt.s32.totalorder %s291_s30, %s291_s30 }
  0x1c   :  { %p298_p0 = por %p297_p13, %p296_p12 }
  0x1e   :  { %p299_p1 = pnand %p298_p0, %p292_p11 }
  0x20   :  { %302 = shalt.err (!%p299_p1)
}
  0x21   :  { %29 = dma.hbm_to_vmem [thread:$0]  %s464_s1, 256, %s27_s12, [#allocation6]  }
  0x22   :  { %325 = dma.done.wait [#allocation3], 256  }
  0x23   :  { %326 = vsyncadd [#allocation3], 4294967040 }
  0x24   :  { %327 = dma.done.wait [#allocation6], 256  }
  0x25   :  { %328 = vsyncadd [#allocation6], 4294967040  ;;  %v50_v0 = vlaneseq  ;;  %v333_v1 = vmov 1983009808   ;;  %v38_v6 = vld [vmem:[#allocation2] sm:$0xff]  ;;  %v39_v7 = vld [vmem:[#allocation2 + $0x8] sm:$0xff] }
  0x26   :  { %v48_v2 = vunpack.c.l.s4 %v333_v1  ;;  %v40_v8 = vld [vmem:[#allocation5] sm:$0xff]  ;;  %v41_v9 = vld [vmem:[#allocation5 + $0x8] sm:$0xff]  ;;  %v334_v10 = vmov 0   ;;  %vm203_vm2 = vcmask 1040384   ;;  %v335_v17 = vmov 1966171168  }
  0x27   :  { %v51_v3 = vshrl.u32 %v50_v0, 7  ;;  %vm42_vm0 = vcmp.ge.f32.partialorder %v38_v6, %v40_v8  ;;  %vm43_vm1 = vcmp.ge.f32.partialorder %v39_v7, %v41_v9  ;;  %v91_v18 = vunpack.c.l.s4 %v335_v17  ;;  %s336_s1 = smov [#allocation7]   ;;  %v234_v6 = vld [vmem:[#allocation7] sm:$0xff] }
  0x28   :  { %v49_v4 = vunpack.c.0.s8 %v48_v2  ;;  %v44_v11 = vsel %vm42_vm0, 1, %v334_v10  ;;  %v45_v12 = vsel %vm43_vm1, 1, %v334_v10  ;;  %vm204_vm3 = vsmask.f32 256  ;;  %s243_s4 = sshll.u32 %s336_s1, 4  ;;  %s244_s4 = int_to_ptr.vmem [resolvable:$true] %s243_s4 }
  0x29   :  { %v46_v13 = vcombine.high %v44_v11, %v44_v11  ;;  %v61_v15 = vcombine.high %v45_v12, %v45_v12  ;;  %vm206_vm5 = vcmask 1041409   ;;  %vm207_vm6 = vsmask.f32 1280  ;;  %vm381_vm9 = vmand %vm203_vm2, %vm204_vm3  ;;  %s303_s5 = scalar_lea.vmem %s244_s4, 128  ;;  %p308_p3 = scmp.lt.s32.totalorder %s244_s4, %s244_s4 }
  0x2a   :  { %v52_v5 = vsub.s32 %v49_v4, %v51_v3  ;;  %v92_v25 = vunpack.c.0.s8 %v91_v18  ;;  %vm386_vm11 = vmand %vm206_vm5, %vm207_vm6  ;;  %vm210_vm12 = vcmask 1042434   ;;  %vm211_vm13 = vsmask.f32 2304  ;;  %p304_p2 = scmp.ne.s32.totalorder %s244_s4, %s303_s5  ;;  %p309_p4 = scmp.lt.s32.totalorder %s303_s5, %s303_s5 }
  0x2b   :  { %vm209_vm14 = vmor %vm386_vm11, %vm381_vm9  ;;  %vm214_vm0 = vcmask 1043459   ;;  %vm215_vm1 = vsmask.f32 3328  ;;  %vm218_vm5 = vcmask 1044484   ;;  %vm219_vm6 = vsmask.f32 4352 }
  0x2c   :  { %v53_v14 = vrot.slane %v44_v11, %v52_v5  ;;  %v68_v16 = vrot.slane %v45_v12, %v52_v5  ;;  %v60_v19 = vrot.slane %v46_v13, %v52_v5  ;;  %v75_v20 = vrot.slane %v61_v15, %v52_v5  ;;  %vm212_vm15 = vmand %vm210_vm12, %vm211_vm13  ;;  %p310_p5 = por %p309_p4, %p308_p3 }
  0x2d   :  { %v395_v31 = vsub.s32 %v92_v25, %v51_v3  ;;  %vm398_vm3 = vmor %vm212_vm15, %vm209_vm14  ;;  %vm223_vm11 = vsmask.f32 5376  ;;  %vm227_vm13 = vsmask.f32 6400 }
  0x2e   :  { %vm76_vm4 = vcmp.ne.s32.totalorder %v53_v14, 0  ;;  %vm78_vm7 = vcmp.ne.s32.totalorder %v68_v16, 0  ;;  %vm77_vm8 = vcmp.ne.s32.totalorder %v60_v19, 0  ;;  %vm79_vm10 = vcmp.ne.s32.totalorder %v75_v20, 0  ;;  %vm220_vm9 = vmand %vm218_vm5, %vm219_vm6  ;;  %p311_p6 = pnand %p310_p5, %p304_p2 }
  0x2f   :  { %v80_v21 = vsel %vm76_vm4, 1, %v334_v10  ;;  %v82_v22 = vsel %vm78_vm7, 1, %v334_v10  ;;  %v81_v24 = vsel %vm77_vm8, 1, %v334_v10  ;;  %v83_v27 = vsel %vm79_vm10, 1, %v334_v10  ;;  %vm403_vm4 = vmand %vm214_vm0, %vm215_vm1 }
  0x30   :  { %v84_v28 = vpack.c.b16 %v81_v24, %v80_v21  ;;  %v85_v29 = vpack.c.b16 %v83_v27, %v82_v22  ;;  %vm217_vm7 = vmor %vm403_vm4, %vm398_vm3  ;;  %vm222_vm8 = vcmask 1045509  }
  0x31   :  { %vm423_vm1 = vmor %vm220_vm9, %vm217_vm7  ;;  %vm478_vm7 = vcmask 1046534   ;;  %vm230_vm9 = vcmask 1047559  }
  0x32   :  { %v86_v30 = vpack.c.b8 %v85_v29, %v84_v28  ;;  %vm429_vm12 = vmand %vm222_vm8, %vm223_vm11 }
  0x33   :  { %vm225_vm4 = vmor %vm429_vm12, %vm423_vm1 }
  0x34   :  { %vm87_vm2 = vnez %v86_v30  ;;  %vm228_vm8 = vmand %vm478_vm7, %vm227_vm13 }
  0x35   :  { %v88_v32 = vsel %vm87_vm2, 16843009, %v334_v10  ;;  %vm229_vm11 = vmor %vm228_vm8, %vm225_vm4 }
  0x36   :  { %v89_v34 = vcombine.high %v88_v32, %v88_v32  ;;  %v96_v35 = vrot.slane %v88_v32, %v395_v31 }
  0x38   :  { %v103_v37 = vrot.slane %v89_v34, %v395_v31  ;;  %v104_v38 = vcombine.high %v96_v35, %v96_v35  ;;  %v112_v39 = vrot.slane %v96_v35, %v395_v31 }
  0x3a   :  { %v105_v40 = vcombine.high %v103_v37, %v103_v37  ;;  %v119_v41 = vrot.slane %v103_v37, %v395_v31  ;;  %v126_v42 = vrot.slane %v104_v38, %v395_v31  ;;  %v134_v43 = vcombine.high %v112_v39, %v112_v39 }
  0x3b   :  { %vm138_vm10 = vnez %v112_v39 }
  0x3c   :  { %v133_v44 = vrot.slane %v105_v40, %v395_v31  ;;  %v135_v45 = vcombine.high %v119_v41, %v119_v41  ;;  %v136_v46 = vcombine.high %v126_v42, %v126_v42  ;;  %vm139_vm14 = vnez %v126_v42 }
  0x3d   :  { %vm140_vm15 = vnez %v134_v43  ;;  %vm142_vm0 = vnez %v119_v41  ;;  %v146_v47 = vsel %vm138_vm10, 16843009, %v334_v10  ;;  %v147_v48 = vsel %vm139_vm14, 16843009, %v334_v10 }
  0x3e   :  { %v137_v50 = vcombine.high %v133_v44, %v133_v44  ;;  %vm141_vm2 = vnez %v136_v46  ;;  %vm143_vm5 = vnez %v133_v44  ;;  %vm144_vm6 = vnez %v135_v45 }
  0x3f   :  { %v148_v52 = vsel %vm140_vm15, 16843009, %v334_v10  ;;  %v149_v53 = vsel %vm141_vm2, 16843009, %v334_v10  ;;  %v150_v54 = vsel %vm142_vm0, 16843009, %v334_v10  ;;  %v154_v55 = vcombine.low %v146_v47, %v147_v48 }
  0x40   :  { %vm145_vm3 = vnez %v137_v50  ;;  %v151_v56 = vsel %vm143_vm5, 16843009, %v334_v10  ;;  %v152_v57 = vsel %vm144_vm6, 16843009, %v334_v10  ;;  %v155_v58 = vcombine.low %v148_v52, %v149_v53 }
  0x41   :  { %v153_v59 = vsel %vm145_vm3, 16843009, %v334_v10  ;;  %v156_v60 = vcombine.low %v150_v54, %v151_v56  ;;  %v164_v61 = vrot.slane %v154_v55, %v395_v31  ;;  %vm231_vm10 = vsmask.f32 7424 }
  0x42   :  { %v157_v62 = vcombine.low %v152_v57, %v153_v59  ;;  %v171_v63 = vrot.slane %v155_v58, %v395_v31  ;;  %vm232_vm14 = vmand %vm230_vm9, %vm231_vm10 }
  0x43   :  { %v178_v0 = vrot.slane %v156_v60, %v395_v31  ;;  %vm233_vm12 = vmor %vm232_vm14, %vm229_vm11 }
  0x44   :  { %v185_v1 = vrot.slane %v157_v62, %v395_v31  ;;  %v186_v2 = vcombine.low %v164_v61, %v171_v63 }
  0x46   :  { %v187_v3 = vcombine.low %v178_v0, %v185_v1  ;;  %v194_v4 = vrot.slane %v186_v2, %v395_v31 }
  0x48   :  { %v201_v5 = vrot.slane %v187_v3, %v395_v31 }
  0x4a   :  { %v202_v7 = vcombine.low %v194_v4, %v201_v5 }
  0x4c   :  { %v235_v8 = vsel %vm233_vm12, %v202_v7, %v234_v6 }
  0x4d   :  { %236 = vst [vmem:[#allocation7] sm:$0xff] %v235_v8 }
  0x4e   :  { %314 = shalt.err (!%p311_p6)
}
  0x4f   :  { %s315_s8 = scalar_lea.hbm %s465_s2, 128 }
  0x50   :  { %p316_p7 = scmp.ne.s32.totalorder %s465_s2, %s315_s8  ;;  %p319_p8 = scmp.lt.u32.totalorder %s315_s8, %s465_s2 }
  0x52   :  { %p321_p9 = pnand %p319_p8, %p316_p7 }
  0x54   :  { %324 = shalt.err (!%p321_p9)
}
  0x55   :  { %246 = dma.vmem_to_hbm [thread:$0]  %s244_s4, 128, %s465_s2, [#allocation4]  }
  0x56   :  { %329 = dma.done.wait [#allocation4], 128  }
  0x57   :  { %330 = vsyncadd [#allocation4], 4294967168 }
  0x58   :  { %250 = vsyncpa [#allocation3], 1 }
  0x59   :  { %251 = vsyncpa [#allocation6], 1 }
  0x5a   :  { %252 = vsyncpa [#allocation4], 1 }

</bundles_post_ra>
